<compile_context>
chip_gen: v6e
topology: v6e:2x2x1
jax: 0.10.0
libtpu: 0.0.40
codegen_flags: <defaults>
</compile_context>

<pallas_src>
import functools

import jax
import jax.numpy as jnp
from jax.experimental import pallas as pl
from jax.experimental.pallas import tpu as pltpu


def _custom_loss_kernel(logits_ref, target_ref, dist_hbm_ref, out_ref,
                        ce_acc, sc_acc, dist_vmem, dist_sem,
                        *, logit_norm: bool, t: float,
                        batch: int, tb: int, classes: int, inner: int):
    p = pl.program_id(0)          # core-parallel axis
    i = pl.program_id(1)          # sequential batch-stream axis

    @pl.when(i == 0)
    def _init():
        ce_acc[...] = jnp.zeros_like(ce_acc)
        sc_acc[...] = jnp.zeros_like(sc_acc)
        # Fetch the (pre-summed) bf16 distance matrix once per core into a
        # single VMEM buffer (no double-buffering of the largest resident).
        cp = pltpu.make_async_copy(dist_hbm_ref, dist_vmem, dist_sem)
        cp.start()
        cp.wait()

    # Logical global step.  Tail / overshoot rows are masked here, so the
    # wrapper never pads (index maps clamp to the last real block).
    g = p * inner + i
    row_ids = g * tb + jax.lax.broadcasted_iota(jnp.int32, (tb, 1), 0)
    valid_b = row_ids < batch
    valid = valid_b.astype(jnp.float32)                              # [TB,1]

    x = logits_ref[...].astype(jnp.float32)                          # [TB,C]
    x = jnp.where(valid_b, x, 0.0)     # kill garbage tail rows (NaN/Inf safe)

    if logit_norm:
        nrm = jnp.sqrt(jnp.sum(x * x, axis=-1, keepdims=True))
        scale = 1.0 / ((nrm + 1e-7) * t)                             # [TB,1]
        x = x * scale                  # single broadcast multiply

    # Numerically stable softmax pieces -- exp computed exactly once; probs
    # are never materialized (normalization folded into a [TB,1] row scale).
    m = jnp.max(x, axis=1, keepdims=True)
    shifted = x - m
    e = jnp.exp(shifted)
    sumexp = jnp.sum(e, axis=1, keepdims=True)
    inv = valid / sumexp                                             # [TB,1]

    # In-register one-hot of the targets (0/1 is exact in bf16).
    tgt = target_ref[...]                                            # [TB,1]
    col_ids = jax.lax.broadcasted_iota(jnp.int32, (tb, classes), 1)
    onehot_b = col_ids == tgt
    onehot = onehot_b.astype(jnp.bfloat16)                           # [TB,C]

    # Cross-entropy per row (exact f32 log-sum-exp chain).
    tgt_logit = jnp.sum(jnp.where(onehot_b, shifted, 0.0),
                        axis=1, keepdims=True)
    ce_acc[...] += valid * (jnp.log(sumexp) - tgt_logit)

    # bf16 MXU row gather: (dist_sim + dist_comp)[target] == onehot @ dist.
    gathered = jnp.dot(onehot, dist_vmem[...],
                       preferred_element_type=jnp.float32)           # [TB,C]
    sc_acc[...] += inv * jnp.sum(e * gathered, axis=1, keepdims=True)

    @pl.when(i == pl.num_programs(1) - 1)
    def _finalize():
        ce = jnp.sum(ce_acc[...]) * (1.0 / batch)
        sc = jnp.sum(sc_acc[...]) * (1.0 / (batch * classes))
        out_ref[...] = (ce + sc).reshape(1, 1, 1)


def _pick_block_b(batch, classes, itemsize):
    """Pick a batch tile that fits a ~40 MiB VMEM budget (v7x-safe)."""
    budget = 40 * 1024 * 1024 - 2 * classes * classes   # room for bf16 dist
    per_row = classes * (2 * itemsize + 32) + 32        # dbl-buf in + f32 temps
    tb = max(16, budget // max(per_row, 1))
    tb = min(tb, 512)                                    # amortizes grid overhead
    tb = min(tb, -(-batch // 16) * 16)                   # no point past batch
    tb = max(16, (int(tb) // 16) * 16)                   # bf16 sublane packing
    return int(tb)


def custom_loss_pallas(logits, target, dist_sim, dist_comp,
                       logit_norm=False, t=1.0, block_b=None, num_cores=2):
    B, C = logits.shape
    itemsize = jnp.dtype(logits.dtype).itemsize
    tb = int(block_b) if block_b is not None else _pick_block_b(B, C, itemsize)

    steps_total = pl.cdiv(B, tb)
    P = max(1, int(num_cores))
    inner = pl.cdiv(steps_total, P)
    last_blk = steps_total - 1

    # No wrapper-side padding of logits: tail rows are masked in-kernel.
    target_col = target.astype(jnp.int32).reshape(B, 1)
    # Both penalty terms carry the same 1/(B*C) weight -> one resident matrix,
    # stored bf16 (MXU-native, half the VMEM/HBM bytes).
    dist_both = (dist_sim.astype(jnp.float32)
                 + dist_comp.astype(jnp.float32)).astype(jnp.bfloat16)

    def row_map(p, i):
        # Clamp so overshoot steps of the parallel split never address a
        # fully out-of-bounds block (their rows are masked in-kernel anyway).
        return (jnp.minimum(p * inner + i, last_blk), 0)

    kernel = functools.partial(
        _custom_loss_kernel, logit_norm=bool(logit_norm), t=float(t),
        batch=B, tb=tb, classes=C, inner=inner)

    est_vmem = (2 * tb * C * itemsize       # logits double-buffer
                + 2 * tb * 4                # target double-buffer
                + C * C * 2                 # resident bf16 dist (single copy)
                + 4 * tb * 4                # accumulators
                + 8 * tb * C * 4            # f32 compute temporaries headroom
                + (4 << 20))
    vmem_limit = int(min(64 * 1024 * 1024, max(16 * 1024 * 1024, est_vmem)))

    out = pl.pallas_call(
        kernel,
        out_shape=jax.ShapeDtypeStruct((P, 1, 1), jnp.float32),
        grid=(P, inner),
        in_specs=[
            pl.BlockSpec((tb, C), row_map),              # logits, streamed
            pl.BlockSpec((tb, 1), row_map),              # targets, streamed
            pl.BlockSpec(memory_space=pl.ANY),           # dist, manual DMA
        ],
        out_specs=pl.BlockSpec((1, 1, 1), lambda p, i: (p, 0, 0)),
        scratch_shapes=[
            pltpu.VMEM((tb, 1), jnp.float32),            # CE accumulator
            pltpu.VMEM((tb, 1), jnp.float32),            # sim+comp accumulator
            pltpu.VMEM((C, C), jnp.bfloat16),            # resident dist copy
            pltpu.SemaphoreType.DMA(()),                 # dist DMA semaphore
        ],
        compiler_params=pltpu.CompilerParams(
            dimension_semantics=("parallel", "arbitrary"),
            vmem_limit_bytes=vmem_limit),
    )(logits, target_col, dist_both)
    return jnp.sum(out)   # reduce per-core partials


def _reference_loss(logits, target, dist_sim, dist_comp, logit_norm, t):
    x = logits.astype(jnp.float32)
    if logit_norm:
        norms = jnp.linalg.norm(x, axis=-1, keepdims=True) + 1e-7
        x = (x / norms) / t
    logp = jax.nn.log_softmax(x, axis=1)
    ce = -jnp.mean(jnp.take_along_axis(logp, target[:, None], axis=1))
    probs = jax.nn.softmax(x, axis=1)
    loss_sim = jnp.mean(probs * dist_sim[target])
    loss_comp = jnp.mean(probs * dist_comp[target])
    return loss_comp + loss_sim + ce


if __name__ == "__main__":
    B, C = 30, 128           # non-multiple-of-16 batch exercises the tail mask
    key = jax.random.PRNGKey(0)
    k1, k2, k3, k4 = jax.random.split(key, 4)

    logits = jax.random.normal(k1, (B, C), dtype=jnp.float32)
    target = jax.random.randint(k2, (B,), 0, C, dtype=jnp.int32)
    dist_sim = jax.random.uniform(k3, (C, C), dtype=jnp.float32)
    dist_comp = 1.0 - jax.random.uniform(k4, (C, C), dtype=jnp.float32)

    for ln in (True, False):
        loss = custom_loss_pallas(logits, target, dist_sim, dist_comp,
                                  logit_norm=ln, t=1.0)
        loss = jax.block_until_ready(loss)
        ref = _reference_loss(logits, target, dist_sim, dist_comp,
                              logit_norm=ln, t=1.0)
        assert jnp.allclose(loss, ref, rtol=1e-3, atol=1e-3), (ln, loss, ref)

    print("KERNEL_OK")
</pallas_src>

<mosaic_0001>
module attributes {stable_mosaic.version = 11 : i64} {
  func.func @_custom_loss_kernel(%arg0: i32, %arg1: i32, %arg2: memref<32x128xf32, #tpu.memory_space<vmem>>, %arg3: memref<32x1xi32, #tpu.memory_space<vmem>>, %arg4: memref<128x128xbf16, #tpu.memory_space<any>>, %arg5: memref<1x1x1xf32, #tpu.memory_space<vmem>>, %arg6: memref<32x1xf32, #tpu.memory_space<vmem>>, %arg7: memref<32x1xf32, #tpu.memory_space<vmem>>, %arg8: memref<128x128xbf16, #tpu.memory_space<vmem>>, %arg9: memref<!tpu.dma_semaphore, #tpu.memory_space<semaphore_mem>>) attributes {dimension_semantics = [#tpu.dimension_semantics<parallel>, #tpu.dimension_semantics<arbitrary>], iteration_bounds = array<i64: 2, 1>, scalar_prefetch = 0 : i64, scratch_operands = 4 : i64, tpu.core_type = #tpu.core_type<tc>, window_params = [{transform_indices = @transform_0, window_bounds = array<i64: 32, 128>}, {transform_indices = @transform_1, window_bounds = array<i64: 32, 1>}, {}, {transform_indices = @transform_3, window_bounds = array<i64: 1, 1, 1>}]} {
    %c0_i32 = arith.constant 0 : i32
    %0 = arith.cmpi eq, %arg1, %c0_i32 : i32
    %1 = arith.extui %0 : i1 to i32
    %c0_i32_0 = arith.constant 0 : i32
    %2 = arith.cmpi ne, %1, %c0_i32_0 : i32
    scf.if %2 {
      %cst_26 = arith.constant 0.000000e+00 : f32
      %67 = vector.broadcast %cst_26 : f32 to vector<32x1xf32>
      %c0_27 = arith.constant 0 : index
      %c0_28 = arith.constant 0 : index
      %68 = vector.load %arg6[%c0_27, %c0_28] : memref<32x1xf32, #tpu.memory_space<vmem>>, vector<32x1xf32>
      tpu.vector_store %arg6[%c0_27, %c0_28], %67 {strides = array<i32>} : memref<32x1xf32, #tpu.memory_space<vmem>>, vector<32x1xf32>,
      %cst_29 = arith.constant 0.000000e+00 : f32
      %69 = vector.broadcast %cst_29 : f32 to vector<32x1xf32>
      %c0_30 = arith.constant 0 : index
      %c0_31 = arith.constant 0 : index
      %70 = vector.load %arg7[%c0_30, %c0_31] : memref<32x1xf32, #tpu.memory_space<vmem>>, vector<32x1xf32>
      tpu.vector_store %arg7[%c0_30, %c0_31], %69 {strides = array<i32>} : memref<32x1xf32, #tpu.memory_space<vmem>>, vector<32x1xf32>,
      tpu.enqueue_dma source(%arg4 : memref<128x128xbf16, #tpu.memory_space<any>>) target(%arg8 : memref<128x128xbf16, #tpu.memory_space<vmem>>) target_semaphore(%arg9 : memref<!tpu.dma_semaphore, #tpu.memory_space<semaphore_mem>>)
      tpu.wait_dma2 semaphore(%arg9 : memref<!tpu.dma_semaphore, #tpu.memory_space<semaphore_mem>>) src(%arg4 : memref<128x128xbf16, #tpu.memory_space<any>>) dst(%arg8 : memref<128x128xbf16, #tpu.memory_space<vmem>>)
    } else {
    }
    %c1_i32 = arith.constant 1 : i32
    %3 = arith.muli %arg0, %c1_i32 : i32
    %4 = arith.addi %3, %arg1 : i32
    %c32_i32 = arith.constant 32 : i32
    %5 = arith.muli %4, %c32_i32 : i32
    %6 = tpu.iota {dimensions = array<i32: 0>} : vector<32x1xi32>
    %7 = vector.broadcast %5 : i32 to vector<32x1xi32>
    %8 = arith.addi %7, %6 : vector<32x1xi32>
    %c30_i32 = arith.constant 30 : i32
    %9 = vector.broadcast %c30_i32 : i32 to vector<32x1xi32>
    %10 = arith.cmpi slt, %8, %9 : vector<32x1xi32>
    %11 = arith.extui %10 : vector<32x1xi1> to vector<32x1xi32>
    %12 = arith.sitofp %11 : vector<32x1xi32> to vector<32x1xf32>
    %c0 = arith.constant 0 : index
    %c0_1 = arith.constant 0 : index
    %13 = vector.load %arg2[%c0, %c0_1] : memref<32x128xf32, #tpu.memory_space<vmem>>, vector<32x128xf32>
    %cst = arith.constant 0.000000e+00 : f32
    %14 = vector.shape_cast %10 : vector<32x1xi1> to vector<32x1xi1>
    %15 = vector.broadcast %14 : vector<32x1xi1> to vector<32x128xi1>
    %16 = vector.broadcast %cst : f32 to vector<32x128xf32>
    %17 = arith.select %15, %13, %16 : vector<32x128xi1>, vector<32x128xf32>
    %18 = arith.mulf %17, %17 : vector<32x128xf32>
    %cst_2 = arith.constant dense<0.000000e+00> : vector<32xf32>
    %19 = vector.multi_reduction <add>, %18, %cst_2 [1] : vector<32x128xf32> to vector<32xf32>
    %20 = vector.shape_cast %19 : vector<32xf32> to vector<32x1xf32>
    %21 = math.sqrt %20 : vector<32x1xf32>
    %cst_3 = arith.constant 1.000000e-07 : f32
    %22 = vector.broadcast %cst_3 : f32 to vector<32x1xf32>
    %23 = arith.addf %21, %22 : vector<32x1xf32>
    %cst_4 = arith.constant 1.000000e+00 : f32
    %24 = vector.broadcast %cst_4 : f32 to vector<32x1xf32>
    %25 = arith.mulf %23, %24 : vector<32x1xf32>
    %cst_5 = arith.constant 1.000000e+00 : f32
    %26 = vector.broadcast %cst_5 : f32 to vector<32x1xf32>
    %27 = arith.divf %26, %25 : vector<32x1xf32>
    %28 = vector.broadcast %27 : vector<32x1xf32> to vector<32x128xf32>
    %29 = arith.mulf %17, %28 : vector<32x128xf32>
    %cst_6 = arith.constant dense<0xFF800000> : vector<32xf32>
    %30 = vector.multi_reduction <maximumf>, %29, %cst_6 [1] : vector<32x128xf32> to vector<32xf32>
    %31 = vector.shape_cast %30 : vector<32xf32> to vector<32x1xf32>
    %32 = vector.broadcast %31 : vector<32x1xf32> to vector<32x128xf32>
    %33 = arith.subf %29, %32 : vector<32x128xf32>
    %34 = math.exp %33 : vector<32x128xf32>
    %cst_7 = arith.constant dense<0.000000e+00> : vector<32xf32>
    %35 = vector.multi_reduction <add>, %34, %cst_7 [1] : vector<32x128xf32> to vector<32xf32>
    %36 = vector.shape_cast %35 : vector<32xf32> to vector<32x1xf32>
    %37 = arith.divf %12, %36 : vector<32x1xf32>
    %c0_8 = arith.constant 0 : index
    %c0_9 = arith.constant 0 : index
    %38 = vector.load %arg3[%c0_8, %c0_9] : memref<32x1xi32, #tpu.memory_space<vmem>>, vector<32x1xi32>
    %39 = tpu.iota {dimensions = array<i32: 1>} : vector<32x128xi32>
    %40 = vector.broadcast %38 : vector<32x1xi32> to vector<32x128xi32>
    %41 = arith.cmpi eq, %39, %40 : vector<32x128xi32>
    %42 = arith.extui %41 : vector<32x128xi1> to vector<32x128xi32>
    %43 = arith.sitofp %42 : vector<32x128xi32> to vector<32x128xf32>
    %44 = arith.truncf %43 : vector<32x128xf32> to vector<32x128xbf16>
    %cst_10 = arith.constant 0.000000e+00 : f32
    %45 = vector.broadcast %cst_10 : f32 to vector<32x128xf32>
    %46 = arith.select %41, %33, %45 : vector<32x128xi1>, vector<32x128xf32>
    %cst_11 = arith.constant dense<0.000000e+00> : vector<32xf32>
    %47 = vector.multi_reduction <add>, %46, %cst_11 [1] : vector<32x128xf32> to vector<32xf32>
    %48 = vector.shape_cast %47 : vector<32xf32> to vector<32x1xf32>
    %c0_12 = arith.constant 0 : index
    %c0_13 = arith.constant 0 : index
    %49 = vector.load %arg6[%c0_12, %c0_13] : memref<32x1xf32, #tpu.memory_space<vmem>>, vector<32x1xf32>
    %50 = math.log %36 : vector<32x1xf32>
    %51 = arith.subf %50, %48 : vector<32x1xf32>
    %52 = arith.mulf %12, %51 : vector<32x1xf32>
    %53 = arith.addf %49, %52 : vector<32x1xf32>
    %c0_14 = arith.constant 0 : index
    %c0_15 = arith.constant 0 : index
    %54 = vector.load %arg6[%c0_14, %c0_15] : memref<32x1xf32, #tpu.memory_space<vmem>>, vector<32x1xf32>
    tpu.vector_store %arg6[%c0_14, %c0_15], %53 {strides = array<i32>} : memref<32x1xf32, #tpu.memory_space<vmem>>, vector<32x1xf32>,
    %c0_16 = arith.constant 0 : index
    %c0_17 = arith.constant 0 : index
    %55 = vector.load %arg8[%c0_16, %c0_17] : memref<128x128xbf16, #tpu.memory_space<vmem>>, vector<128x128xbf16>
    %cst_18 = arith.constant dense<0.000000e+00> : vector<32x128xf32>
    %56 = tpu.matmul %44, %55, %cst_18 {dimension_numbers = #tpu.dot_dimension_numbers<[1], [0], [0], [1], [0, 0, 1, 1], [], []>} : vector<32x128xbf16>, vector<128x128xbf16>, vector<32x128xf32> -> vector<32x128xf32>
    %c0_19 = arith.constant 0 : index
    %c0_20 = arith.constant 0 : index
    %57 = vector.load %arg7[%c0_19, %c0_20] : memref<32x1xf32, #tpu.memory_space<vmem>>, vector<32x1xf32>
    %58 = arith.mulf %34, %56 : vector<32x128xf32>
    %cst_21 = arith.constant dense<0.000000e+00> : vector<32xf32>
    %59 = vector.multi_reduction <add>, %58, %cst_21 [1] : vector<32x128xf32> to vector<32xf32>
    %60 = vector.shape_cast %59 : vector<32xf32> to vector<32x1xf32>
    %61 = arith.mulf %37, %60 : vector<32x1xf32>
    %62 = arith.addf %57, %61 : vector<32x1xf32>
    %c0_22 = arith.constant 0 : index
    %c0_23 = arith.constant 0 : index
    %63 = vector.load %arg7[%c0_22, %c0_23] : memref<32x1xf32, #tpu.memory_space<vmem>>, vector<32x1xf32>
    tpu.vector_store %arg7[%c0_22, %c0_23], %62 {strides = array<i32>} : memref<32x1xf32, #tpu.memory_space<vmem>>, vector<32x1xf32>,
    %c0_i32_24 = arith.constant 0 : i32
    %64 = arith.cmpi eq, %arg1, %c0_i32_24 : i32
    %65 = arith.extui %64 : i1 to i32
    %c0_i32_25 = arith.constant 0 : i32
    %66 = arith.cmpi ne, %65, %c0_i32_25 : i32
    scf.if %66 {
      %c0_26 = arith.constant 0 : index
      %c0_27 = arith.constant 0 : index
      %67 = vector.load %arg6[%c0_26, %c0_27] : memref<32x1xf32, #tpu.memory_space<vmem>>, vector<32x1xf32>
      %68 = vector.shape_cast %67 : vector<32x1xf32> to vector<1x32x1xf32>
      %cst_28 = arith.constant dense<0.000000e+00> : vector<1xf32>
      %69 = vector.multi_reduction <add>, %68, %cst_28 [1, 2] : vector<1x32x1xf32> to vector<1xf32>
      %70 = vector.shape_cast %69 : vector<1xf32> to vector<1x1x1xf32>
      %71 = vector.extract %70[0, 0, 0] : f32 from vector<1x1x1xf32>
      %cst_29 = arith.constant 0.0333333351 : f32
      %72 = arith.mulf %71, %cst_29 : f32
      %c0_30 = arith.constant 0 : index
      %c0_31 = arith.constant 0 : index
      %73 = vector.load %arg7[%c0_30, %c0_31] : memref<32x1xf32, #tpu.memory_space<vmem>>, vector<32x1xf32>
      %74 = vector.shape_cast %73 : vector<32x1xf32> to vector<1x32x1xf32>
      %cst_32 = arith.constant dense<0.000000e+00> : vector<1xf32>
      %75 = vector.multi_reduction <add>, %74, %cst_32 [1, 2] : vector<1x32x1xf32> to vector<1xf32>
      %76 = vector.shape_cast %75 : vector<1xf32> to vector<1x1x1xf32>
      %77 = vector.extract %76[0, 0, 0] : f32 from vector<1x1x1xf32>
      %cst_33 = arith.constant 2.6041668E-4 : f32
      %78 = arith.mulf %77, %cst_33 : f32
      %79 = arith.addf %72, %78 : f32
      %80 = vector.broadcast %79 : f32 to vector<1x1x1xf32>
      %c0_34 = arith.constant 0 : index
      %c0_35 = arith.constant 0 : index
      %c0_36 = arith.constant 0 : index
      %81 = vector.load %arg5[%c0_34, %c0_35, %c0_36] : memref<1x1x1xf32, #tpu.memory_space<vmem>>, vector<1x1x1xf32>
      tpu.vector_store %arg5[%c0_34, %c0_35, %c0_36], %80 {strides = array<i32>} : memref<1x1x1xf32, #tpu.memory_space<vmem>>, vector<1x1x1xf32>,
    } else {
    }
    return
  }
  func.func @transform_0(%arg0: i32, %arg1: i32) -> (i32, i32) {
    %c1_i32 = arith.constant 1 : i32
    %0 = arith.muli %arg0, %c1_i32 : i32
    %1 = arith.addi %0, %arg1 : i32
    %c0_i32 = arith.constant 0 : i32
    %2 = arith.minsi %1, %c0_i32 : i32
    %c0_i32_0 = arith.constant 0 : i32
    %c0_i32_1 = arith.constant 0 : i32
    return %2, %c0_i32_0 : i32, i32
  }
  func.func @transform_1(%arg0: i32, %arg1: i32) -> (i32, i32) {
    %c1_i32 = arith.constant 1 : i32
    %0 = arith.muli %arg0, %c1_i32 : i32
    %1 = arith.addi %0, %arg1 : i32
    %c0_i32 = arith.constant 0 : i32
    %2 = arith.minsi %1, %c0_i32 : i32
    %c0_i32_0 = arith.constant 0 : i32
    %c0_i32_1 = arith.constant 0 : i32
    return %2, %c0_i32_0 : i32, i32
  }
  func.func @transform_3(%arg0: i32, %arg1: i32) -> (i32, i32, i32) {
    %c0_i32 = arith.constant 0 : i32
    %c0_i32_0 = arith.constant 0 : i32
    %c0_i32_1 = arith.constant 0 : i32
    return %arg0, %c0_i32, %c0_i32_0 : i32, i32, i32
  }
}

</mosaic_0001>

<bundles_post_ra>
// kernel: tpu_custom_call.1
= control target key start
LH: loop header
LB: loop body
LE: loop exit
PB: predicated region body
PF: predicated region fallthrough
CT: control target
= control target key end

     0   :  { %s927_s12 = smov 0   ;;  %s929_s13 = smov 0   ;;  %s1113_s0 = inlined_call_operand.vmem [shape: f32[30,128], index: 0, kind: input, shape index: {}]   ;;  %s1114_s1 = inlined_call_operand.vmem [shape: s32[30,1], index: 1, kind: input, shape index: {}]   ;;  %s1115_s2 = inlined_call_operand.hbm [shape: bf16[128,128], index: 2, kind: input, shape index: {}]   ;;  %s1116_s3 = inlined_call_operand.vmem [shape: f32[2,1,1], index: 3, kind: output, shape index: {}]  }
   0x1   :  { %s931_s14 = smov 0  }
   0x2 LB: > { %s25_s15 = sadd.s32 1, %s897_s13  ;;  %p716_p0 = scmp.ge.s32.totalorder %s901_s14, 1  ;;  %s901_s14 = sphi %s931_s14, %s13_s14   ;;  %s897_s13 = sphi %s929_s13, %s1118_s13   ;;  %s893_s12 = sphi %s927_s12, %s1117_s12  }
   0x3   : > { %p27_p1 = scmp.ge.s32.totalorder %s25_s15, 2  ;;  %p161_p2 = scmp.lt.s32.totalorder %s901_s14, 3 }
   0x5   : > { %s1120_s15 = smov (%p27_p1, %s25_s15), 0  ;;  %p162_p3 = pnand %p716_p0, %p161_p2 }
   0x6   : > { %p193_p4 = scmp.lt.s32.totalorder (!%p162_p3), %s893_s12, 0  ;;  %p216_p5 = scmp.lt.s32.totalorder (!%p162_p3), %s893_s12, 1 }
   0x7   : > { %165 = sbr.rel (%p162_p3) target bundleno = 779 (0x30b), region = 28  ;;  %s904_s19 = smov (!%p162_p3), [#allocation4]  }
   0x8   : > { %s240_s20 = sshll.u32 (!%p162_p3), %s904_s19, 4  ;;  %s241_s20 = int_to_ptr.vmem [resolvable:$true] %s240_s20 }
   0x9   : > { %s865_s24 = scalar_lea.vmem (!%p162_p3), %s241_s20, 1024  ;;  %p870_p8 = scmp.lt.s32.totalorder (!%p162_p3), %s241_s20, %s241_s20 }
   0xa   : > { %p866_p7 = scmp.ne.s32.totalorder (!%p162_p3), %s241_s20, %s865_s24  ;;  %p871_p9 = scmp.lt.s32.totalorder (!%p162_p3), %s865_s24, %s865_s24 }
   0xc   : > { %vm224_vm0 = vcmask 7168   ;;  %v903_v0 = vmov 0.0   ;;  %s194_s16 = scalar_select %p193_p4, %s893_s12, 0 }
   0xd   : > { %225 = vst.msk [vmem:[#allocation2] sm:$0xff] %vm224_vm0, %v903_v0  ;;  %226 = vst.msk [vmem:[#allocation2 + $0x8] sm:$0xff] %vm224_vm0, %v903_v0  ;;  %s967_s17 = scalar_select %p216_p5, %s893_s12, 1 }
   0xe   : > { %227 = vst.msk [vmem:[#allocation2 + $0x10] sm:$0xff] %vm224_vm0, %v903_v0  ;;  %228 = vst.msk [vmem:[#allocation2 + $0x18] sm:$0xff] %vm224_vm0, %v903_v0  ;;  %s717_s18 = sshll.u32 %s194_s16, 2  ;;  %p872_p10 = por %p871_p9, %p870_p8 }
   0xf   : > { %229 = vst.msk [vmem:[#allocation3] sm:$0xff] %vm224_vm0, %v903_v0  ;;  %230 = vst.msk [vmem:[#allocation3 + $0x8] sm:$0xff] %vm224_vm0, %v903_v0  ;;  %p196_p6 = scmp.lt.s32.totalorder %s717_s18, 3  ;;  %s218_s23 = scalar_lea.vmem %s1116_s3, %s967_s17 }
  0x10   : > { %231 = vst.msk [vmem:[#allocation3 + $0x10] sm:$0xff] %vm224_vm0, %v903_v0  ;;  %232 = vst.msk [vmem:[#allocation3 + $0x18] sm:$0xff] %vm224_vm0, %v903_v0  ;;  %p873_p11 = pnand %p872_p10, %p866_p7 }
  0x11   : > { %s1122_s18 = smov (!%p196_p6, %s717_s18), 3 }
  0x12   : > { %876 = shalt.err (!%p873_p11)  }
  0x13   : > { %243 = dma.hbm_to_vmem [thread:$0]  %s1115_s2, 1024, %s241_s20, [#allocation5] }
  0x14   : > { %s718_s27 = sshll.u32 %s1122_s18, 3 }
  0x15   : > { %s979_s30 = scalar_lea.vmem %s1113_s0, %s718_s27  ;;  %s211_s6 = scalar_lea.vmem %s1114_s1, %s718_s27 }
  0x16   : > { %889 = dma.done.wait [#allocation5], 1024 }
  0x17   : > { %890 = vsyncadd [#allocation5], 4294966272  ;;  %v905_v1 = vmov 0   ;;  %v378_v2 = vld [vmem:[%s211_s6 + $0x10] sm:$0xff]  ;;  %v376_v3 = vld [vmem:[%s211_s6] sm:$0xff]  ;;  %v250_v10 = vlaneseq  ;;  %s721_s7 = sshll.u32 %s893_s12, 5 }
  0x18   : > { %808 = vset.pattern.permute.xlu1 %v905_v1  ;;  %807 = vset.pattern.permute.xlu0 %v905_v1  ;;  %v379_v4 = vld [vmem:[%s211_s6 + $0x18] sm:$0xff]  ;;  %v377_v5 = vld [vmem:[%s211_s6 + $0x8] sm:$0xff]  ;;  %v810_v7 = vld [vmem:[#allocation4 + $0x30] sm:$0xff]   ;;  %v255_v13 = vstv %s721_s7  ;;  %v906_v41 = vmov 1.0|1.0  }
  0x19   : > { %389 = vperm.xlu1 %808, %v378_v2   ;;  %383 = vperm.xlu0 %807, %v376_v3   ;;  %v809_v6 = vld [vmem:[#allocation4 + $0x38] sm:$0xff]   ;;  %v811_v8 = vld [vmem:[#allocation4 + $0x28] sm:$0xff]   ;;  %v812_v9 = vld [vmem:[#allocation4 + $0x20] sm:$0xff]   ;;  %v251_v12 = vshrl.u32 %v250_v10, 7  ;;  %v1029_v38 = vand.u32 127, %v250_v10 }
  0x1a   : > { %755 = vmatprep.subr.bf16.mxu0 %v809_v6  ;;  %v813_v11 = vld [vmem:[#allocation4 + $0x18] sm:$0xff]   ;;  %v814_v14 = vld [vmem:[#allocation4 + $0x10] sm:$0xff]   ;;  %v815_v18 = vld [vmem:[#allocation4 + $0x8] sm:$0xff]  }
  0x1b   : > { %756 = vmatpush3.bf16.msra.mxu0 %v809_v6  ;;  %v985_v15 = vadd.s32 %v255_v13, %v251_v12  ;;  %v253_v16 = vadd.s32 16, %v251_v12  ;;  %v252_v17 = vadd.s32 8, %v251_v12  ;;  %v272_v19 = vld [vmem:[%s979_s30] sm:$0xff]  ;;  %v254_v21 = vadd.s32 24, %v251_v12  ;;  %v274_v25 = vld [vmem:[%s979_s30 + $0x10] sm:$0xff]  ;;  %v273_v27 = vld [vmem:[%s979_s30 + $0x8] sm:$0xff] }
  0x1c   : > { %757 = vmatprep.subr.bf16.mxu0 %v810_v7  ;;  %v816_v23 = vld [vmem:[#allocation4] sm:$0xff]   ;;  %v275_v31 = vld [vmem:[%s979_s30 + $0x18] sm:$0xff] }
  0x1d   : > { %392 = vperm.xlu1 %808, %v379_v4   ;;  %386 = vperm.xlu0 %807, %v377_v5   ;;  %vm260_vm1 = vcmp.lt.s32.totalorder %v985_v15, 30  ;;  %v989_v20 = vadd.s32 %v255_v13, %v253_v16  ;;  %v991_v22 = vadd.s32 %v255_v13, %v252_v17  ;;  %v999_v26 = vadd.s32 %v255_v13, %v254_v21 }
  0x1e   : > { %v995_v24 = vsel %vm260_vm1, %v272_v19, 0.0 }
  0x1f   : > { %758 = vmatpush3.bf16.msra.mxu0 %v810_v7  ;;  %vm262_vm2 = vcmp.lt.s32.totalorder %v989_v20, 30  ;;  %vm261_vm3 = vcmp.lt.s32.totalorder %v991_v22, 30  ;;  %v284_v28 = vmul.f32 %v995_v24, %v995_v24  ;;  %vm263_vm4 = vcmp.lt.s32.totalorder %v999_v26, 30 }
  0x20   : > { %759 = vmatprep.subr.bf16.mxu0 %v811_v8  ;;  %v1007_v29 = vsel %vm262_vm2, %v274_v25, 0.0  ;;  %v1011_v30 = vsel %vm261_vm3, %v273_v27, 0.0  ;;  %v1021_v34 = vsel %vm263_vm4, %v275_v31, 0.0  ;;  %v725_v15 = vsel %vm263_vm4, 1.0, %v903_v0 }
  0x21   : > { %v286_v32 = vmul.f32 %v1007_v29, %v1007_v29  ;;  %v285_v33 = vmul.f32 %v1011_v30, %v1011_v30  ;;  %v287_v35 = vmul.f32 %v1021_v34, %v1021_v34 }
  0x23   : > { %760 = vmatpush3.bf16.msra.mxu0 %v811_v8 }
  0x24   : > { %761 = vmatprep.subr.bf16.mxu0 %v812_v9 }
  0x27   : > { %762 = vmatpush3.bf16.msra.mxu0 %v812_v9 }
  0x28   : > { %763 = vmatprep.subr.bf16.mxu0 %v813_v11 }
  0x2b   : > { %764 = vmatpush3.bf16.msra.mxu0 %v813_v11 }
  0x2c   : > { %765 = vmatprep.subr.bf16.mxu0 %v814_v14 }
  0x2f   : > { %766 = vmatpush3.bf16.msra.mxu0 %v814_v14 }
  0x30   : > { %767 = vmatprep.subr.bf16.mxu0 %v815_v18 }
  0x33   : > { %768 = vmatpush3.bf16.msra.mxu0 %v815_v18 }
  0x34   : > { %769 = vmatprep.subr.bf16.mxu0 %v816_v23 }
  0x37   : > { %770 = vmatpush3.bf16.msra.mxu0 %v816_v23 }
  0x3c   : > { %288 = vadd.xlane.f32.xlu0 %v284_v28 }
  0x40   : > { %292 = vadd.xlane.f32.xlu0 %v286_v32 }
  0x41   : > { %290 = vadd.xlane.f32.xlu1 %v285_v33 }
  0x44   : > { %294 = vadd.xlane.f32.xlu0 %v287_v35 }
  0x94   : > { %v1025_v36 = vpop.permute.xlu1 %389  ;;  %v1027_v37 = vpop.permute.xlu0 %383 }
  0x95   : > { %vm396_vm5 = vcmp.eq.s32.totalorder %v1029_v38, %v1025_v36  ;;  %vm394_vm8 = vcmp.eq.s32.totalorder %v1029_v38, %v1027_v37 }
  0x98   : > { %v1031_v39 = vpop.permute.xlu1 %392  ;;  %v1033_v40 = vpop.permute.xlu0 %386 }
  0x99   : > { %vm397_vm6 = vcmp.eq.s32.totalorder %v1029_v38, %v1031_v39  ;;  %vm395_vm7 = vcmp.eq.s32.totalorder %v1029_v38, %v1033_v40 }
  0x9a   : > { %vm740_vm9 = vmpackc.low %vm397_vm6, %vm396_vm5 }
  0x9b   : > { %vm738_vm10 = vmpackc.low %vm395_vm7, %vm394_vm8 }
  0x9c   : > { %771 = vmatprep.mubr.msk.bf16.mxu0 %vm738_vm10, %v906_v41 }
  0x9d   : > { %772 = vmatmul.mubr.msk.bf16.vlgmr.msra.gmra.mxu0 %vm740_vm9, %v906_v41 }
  0xc5   : > { %v289_v42 = vpop.xlane.xlu0 %288 }
  0xc6   : > { %817 = vrsqrt.f32 %v289_v42  ;;  %vm298_vm11 = vcmp.eq.f32.partialorder %v289_v42, inf  ;;  %v301_v48 = vand.u32 2147483648, %v289_v42  ;;  %vm300_vm12 = vcmp.eq.f32.partialorder %v289_v42, 0.0 }
  0xc9   : > { %v293_v43 = vpop.xlane.xlu0 %292 }
  0xca   : > { %819 = vrsqrt.f32 %v293_v43  ;;  %v291_v44 = vpop.xlane.xlu1 %290  ;;  %vm312_vm13 = vcmp.eq.f32.partialorder %v293_v43, inf  ;;  %vm314_vm14 = vcmp.eq.f32.partialorder %v293_v43, 0.0  ;;  %v315_v55 = vand.u32 2147483648, %v293_v43 }
  0xcb   : > { %821 = vrsqrt.f32 %v291_v44  ;;  %vm305_vm15 = vcmp.eq.f32.partialorder %v291_v44, inf  ;;  %v308_v58 = vand.u32 2147483648, %v291_v44  ;;  %vm307_vm9 = vcmp.eq.f32.partialorder %v291_v44, 0.0 }
  0xcd   : > { %v295_v45 = vpop.xlane.xlu0 %294 }
  0xce   : > { %823 = vrsqrt.f32 %v295_v45  ;;  %vm319_vm10 = vcmp.eq.f32.partialorder %v295_v45, inf  ;;  %v322_v3 = vand.u32 2147483648, %v295_v45 }
  0xd3   : > { %v818_v46 = vpop.eup %817 }
  0xd4   : > { %v297_v47 = vmul.f32 %v818_v46, %v289_v42 }
  0xd6   : > { %v299_v49 = vsel %vm298_vm11, %v289_v42, %v297_v47  ;;  %vm321_vm11 = vcmp.eq.f32.partialorder %v295_v45, 0.0 }
  0xd7   : > { %v820_v50 = vpop.eup %819  ;;  %v302_v51 = vsel %vm300_vm12, %v301_v48, %v299_v49 }
  0xd8   : > { %v822_v52 = vpop.eup %821  ;;  %v324_v53 = vadd.f32 1e-07, %v302_v51  ;;  %v311_v54 = vmul.f32 %v820_v50, %v293_v43 }
  0xd9   : > { %v304_v56 = vmul.f32 %v822_v52, %v291_v44 }
  0xda   : > { %825 = vrcp.f32 %v324_v53  ;;  %v313_v57 = vsel %vm312_vm13, %v293_v43, %v311_v54 }
  0xdb   : > { %v824_v59 = vpop.eup %823  ;;  %v316_v60 = vsel %vm314_vm14, %v315_v55, %v313_v57  ;;  %v306_v61 = vsel %vm305_vm15, %v291_v44, %v304_v56  ;;  %v724_v56 = vsel %vm262_vm2, 1.0, %v903_v0 }
  0xdc   : > { %v326_v62 = vadd.f32 1e-07, %v316_v60  ;;  %v309_v63 = vsel %vm307_vm9, %v308_v58, %v306_v61  ;;  %v318_v1 = vmul.f32 %v824_v59, %v295_v45  ;;  %v722_v59 = vsel %vm260_vm1, 1.0, %v903_v0 }
  0xdd   : > { %v325_v2 = vadd.f32 1e-07, %v309_v63  ;;  %v723_v63 = vsel %vm261_vm3, 1.0, %v903_v0  ;;  %v421_v0 = vld [vmem:[#allocation2 + $0x8] sm:$0xff] }
  0xde   : > { %827 = vrcp.f32 %v326_v62  ;;  %v320_v4 = vsel %vm319_vm10, %v295_v45, %v318_v1 }
  0xdf   : > { %829 = vrcp.f32 %v325_v2  ;;  %v323_v5 = vsel %vm321_vm11, %v322_v3, %v320_v4  ;;  %v420_v2 = vld [vmem:[#allocation2] sm:$0xff] }
  0xe0   : > { %v327_v6 = vadd.f32 1e-07, %v323_v5 }
  0xe2   : > { %831 = vrcp.f32 %v327_v6  ;;  %v564_v6 = vld [vmem:[#allocation3 + $0x10] sm:$0xff] }
  0xe7   : > { %v826_v7 = vpop.eup %825 }
  0xe8   : > { %v336_v8 = vmul.f32 %v826_v7, %v995_v24 }
  0xea   : > { %340 = vmax.xlane.f32.xlu1 %v336_v8 }
  0xeb   : > { %v828_v9 = vpop.eup %827 }
  0xec   : > { %v830_v10 = vpop.eup %829  ;;  %v338_v11 = vmul.f32 %v828_v9, %v1007_v29 }
  0xed   : > { %v337_v12 = vmul.f32 %v830_v10, %v1011_v30 }
  0xee   : > { %344 = vmax.xlane.f32.xlu1 %v338_v11 }
  0xef   : > { %v832_v13 = vpop.eup %831  ;;  %342 = vmax.xlane.f32.xlu0 %v337_v12 }
  0xf0   : > { %v339_v14 = vmul.f32 %v832_v13, %v1021_v34 }
  0xf3   : > { %346 = vmax.xlane.f32.xlu0 %v339_v14 }
 0x15d   : > { %v773_v32 = vpop.f32.mrf.mxu0 }
 0x15f   : > { %v547_v35 = vpop.f32.mrf.mxu0 }
 0x161   : > { %v774_v43 = vpop.f32.mrf.mxu0 }
 0x163   : > { %v550_v46 = vpop.f32.mrf.mxu0 }
 0x173   : > { %v341_v16 = vpop.xlane.xlu1 %340 }
 0x174   : > { %v348_v17 = vsub.f32 %v336_v8, %v341_v16 }
 0x176   : > { %v352_v18 = vmul.f32 1.442695, %v348_v17  ;;  %v408_v41 = vsel %vm394_vm8, %v348_v17, 0.0  ;;  %v563_v17 = vld [vmem:[#allocation3 + $0x8] sm:$0xff] }
 0x177   : > { %v345_v19 = vpop.xlane.xlu1 %344 }
 0x178   : > { %833 = vpow2.f32 %v352_v18  ;;  %v350_v21 = vsub.f32 %v338_v11, %v345_v19  ;;  %v343_v23 = vpop.xlane.xlu0 %342 }
 0x179   : > { %v349_v24 = vsub.f32 %v337_v12, %v343_v23  ;;  %v562_v12 = vld [vmem:[#allocation3] sm:$0xff] }
 0x17a   : > { %v356_v25 = vmul.f32 1.442695, %v350_v21  ;;  %v410_v44 = vsel %vm396_vm5, %v350_v21, 0.0  ;;  %v422_v21 = vld [vmem:[#allocation2 + $0x10] sm:$0xff] }
 0x17b   : > { %v354_v27 = vmul.f32 1.442695, %v349_v24  ;;  %v409_v45 = vsel %vm395_vm7, %v349_v24, 0.0 }
 0x17c   : > { %835 = vpow2.f32 %v356_v25  ;;  %v347_v28 = vpop.xlane.xlu0 %346 }
 0x17d   : > { %837 = vpow2.f32 %v354_v27  ;;  %v351_v29 = vsub.f32 %v339_v14, %v347_v28 }
 0x17f   : > { %v358_v30 = vmul.f32 1.442695, %v351_v29  ;;  %v411_v37 = vsel %vm397_vm6, %v351_v29, 0.0 }
 0x181   : > { %839 = vpow2.f32 %v358_v30 }
 0x185   : > { %v834_v31 = vpop.eup %833 }
 0x186   : > { %360 = vadd.xlane.f32.xlu1 %v834_v31  ;;  %v566_v49 = vmul.f32 %v834_v31, %v547_v35 }
 0x189   : > { %v836_v33 = vpop.eup %835 }
 0x18a   : > { %v838_v34 = vpop.eup %837  ;;  %364 = vadd.xlane.f32.xlu1 %v836_v33  ;;  %v568_v48 = vmul.f32 %v836_v33, %v773_v32  ;;  %v565_v32 = vld [vmem:[#allocation3 + $0x18] sm:$0xff] }
 0x18b   : > { %362 = vadd.xlane.f32.xlu0 %v838_v34  ;;  %v567_v47 = vmul.f32 %v838_v34, %v550_v46 }
 0x18e   : > { %v840_v42 = vpop.eup %839  ;;  %412 = vadd.xlane.f32.xlu1 %v408_v41 }
 0x18f   : > { %366 = vadd.xlane.f32.xlu0 %v840_v42  ;;  %v569_v36 = vmul.f32 %v840_v42, %v774_v43 }
 0x192   : > { %416 = vadd.xlane.f32.xlu1 %v410_v44  ;;  %v423_v44 = vld [vmem:[#allocation2 + $0x18] sm:$0xff] }
 0x193   : > { %414 = vadd.xlane.f32.xlu0 %v409_v45 }
 0x196   : > { %572 = vadd.xlane.f32.xlu1 %v567_v47 }
 0x197   : > { %418 = vadd.xlane.f32.xlu0 %v411_v37 }
 0x19a   : > { %574 = vadd.xlane.f32.xlu1 %v568_v48 }
 0x19b   : > { %570 = vadd.xlane.f32.xlu0 %v566_v49 }
 0x19f   : > { %576 = vadd.xlane.f32.xlu0 %v569_v36 }
 0x20f   : > { %v361_v50 = vpop.xlane.xlu1 %360 }
 0x210   : > { %841 = vlog2.f32 %v361_v50 }
 0x211   : > { %843 = vrcp.f32 %v361_v50 }
 0x213   : > { %v365_v40 = vpop.xlane.xlu1 %364 }
 0x214   : > { %845 = vrcp.f32 %v365_v40  ;;  %v363_v51 = vpop.xlane.xlu0 %362 }
 0x215   : > { %847 = vlog2.f32 %v365_v40 }
 0x216   : > { %849 = vrcp.f32 %v363_v51 }
 0x217   : > { %851 = vlog2.f32 %v363_v51  ;;  %v413_v52 = vpop.xlane.xlu1 %412 }
 0x218   : > { %v367_v53 = vpop.xlane.xlu0 %366 }
 0x219   : > { %853 = vrcp.f32 %v367_v53 }
 0x21a   : > { %855 = vlog2.f32 %v367_v53 }
 0x21b   : > { %v417_v38 = vpop.xlane.xlu1 %416 }
 0x21c   : > { %v415_v39 = vpop.xlane.xlu0 %414 }
 0x21d   : > { %v842_v54 = vpop.eup %841 }
 0x21e   : > { %v425_v55 = vmul.f32 0.6931472, %v842_v54  ;;  %v844_v58 = vpop.eup %843 }
 0x21f   : > { %v573_v57 = vpop.xlane.xlu1 %572  ;;  %v369_v8 = vmul.f32 %v844_v58, %v722_v59 }
 0x220   : > { %v419_v60 = vpop.xlane.xlu0 %418  ;;  %v432_v62 = vsub.f32 %v425_v55, %v413_v52 }
 0x221   : > { %v846_v61 = vpop.eup %845 }
 0x222   : > { %v848_v1 = vpop.eup %847  ;;  %v373_v3 = vmul.f32 %v846_v61, %v724_v56  ;;  %v436_v5 = vmul.f32 %v722_v59, %v432_v62 }
 0x223   : > { %v850_v4 = vpop.eup %849  ;;  %v429_v20 = vmul.f32 0.6931472, %v848_v1  ;;  %v575_v7 = vpop.xlane.xlu1 %574 }
 0x224   : > { %v852_v9 = vpop.eup %851  ;;  %v371_v10 = vmul.f32 %v850_v4, %v723_v63  ;;  %v580_v11 = vmul.f32 %v575_v7, %v373_v3  ;;  %v571_v13 = vpop.xlane.xlu0 %570  ;;  %v440_v22 = vadd.f32 %v436_v5, %v420_v2 }
 0x225   : > { %v434_v14 = vsub.f32 %v429_v20, %v417_v38  ;;  %v427_v16 = vmul.f32 0.6931472, %v852_v9  ;;  %v578_v18 = vmul.f32 %v571_v13, %v369_v8 }
 0x226   : > { %v854_v19 = vpop.eup %853  ;;  %v579_v23 = vmul.f32 %v573_v57, %v371_v10  ;;  %v584_v24 = vadd.f32 %v580_v11, %v564_v6  ;;  %445 = vst.msk [vmem:[#allocation2] sm:$0xff] %vm224_vm0, %v440_v22 }
 0x227   : > { %v856_v25 = vpop.eup %855  ;;  %v438_v27 = vmul.f32 %v724_v56, %v434_v14  ;;  %v433_v28 = vsub.f32 %v427_v16, %v415_v39  ;;  %v582_v29 = vadd.f32 %v578_v18, %v562_v12  ;;  %v375_v26 = vmul.f32 %v854_v19, %v725_v15 }
 0x228   : > { %v583_v30 = vadd.f32 %v579_v23, %v563_v17  ;;  %v431_v31 = vmul.f32 0.6931472, %v856_v25  ;;  %588 = vst.msk [vmem:[#allocation3 + $0x10] sm:$0xff] %vm224_vm0, %v584_v24  ;;  %v577_v33 = vpop.xlane.xlu0 %576 }
 0x229   : > { %v442_v34 = vadd.f32 %v438_v27, %v422_v21  ;;  %v437_v35 = vmul.f32 %v723_v63, %v433_v28  ;;  %586 = vst.msk [vmem:[#allocation3] sm:$0xff] %vm224_vm0, %v582_v29  ;;  %v581_v41 = vmul.f32 %v577_v33, %v375_v26 }
 0x22a   : > { %587 = vst.msk [vmem:[#allocation3 + $0x8] sm:$0xff] %vm224_vm0, %v583_v30  ;;  %v435_v42 = vsub.f32 %v431_v31, %v419_v60 }
 0x22b   : > { %447 = vst.msk [vmem:[#allocation2 + $0x10] sm:$0xff] %vm224_vm0, %v442_v34  ;;  %v441_v43 = vadd.f32 %v437_v35, %v421_v0  ;;  %v585_v45 = vadd.f32 %v581_v41, %v565_v32 }
 0x22c   : > { %v439_v46 = vmul.f32 %v725_v15, %v435_v42 }
 0x22d   : > { %446 = vst.msk [vmem:[#allocation2 + $0x8] sm:$0xff] %vm224_vm0, %v441_v43  ;;  %589 = vst.msk [vmem:[#allocation3 + $0x18] sm:$0xff] %vm224_vm0, %v585_v45  ;;  %v593_v40 = vld [vmem:[#allocation2] sm:$0xff] }
 0x22e   : > { %v443_v47 = vadd.f32 %v439_v46, %v423_v44  ;;  %v597_v56 = vsel %vm224_vm0, %v593_v40, 0.0 }
 0x22f   : > { %v616_v49 = vld [vmem:[#allocation3 + $0x10] sm:$0xff] }
 0x230   : > { %448 = vst.msk [vmem:[#allocation2 + $0x18] sm:$0xff] %vm224_vm0, %v443_v47  ;;  %v614_v37 = vld [vmem:[#allocation3] sm:$0xff]  ;;  %v621_v53 = vsel %vm224_vm0, %v616_v49, 0.0 }
 0x231   : > { %v615_v48 = vld [vmem:[#allocation3 + $0x8] sm:$0xff]  ;;  %v618_v36 = vsel %vm224_vm0, %v614_v37, 0.0 }
 0x232   : > { %v619_v50 = vsel %vm224_vm0, %v615_v48, 0.0  ;;  %v595_v39 = vld [vmem:[#allocation2 + $0x10] sm:$0xff] }
 0x233   : > { %v620_v51 = vadd.f32 %v619_v50, %v618_v36  ;;  %v600_v61 = vsel %vm224_vm0, %v595_v39, 0.0 }
 0x234   : > { %v617_v52 = vld [vmem:[#allocation3 + $0x18] sm:$0xff]  ;;  %v594_v38 = vld [vmem:[#allocation2 + $0x8] sm:$0xff] }
 0x235   : > { %v622_v54 = vadd.f32 %v621_v53, %v620_v51  ;;  %v623_v55 = vsel %vm224_vm0, %v617_v52, 0.0  ;;  %v598_v57 = vsel %vm224_vm0, %v594_v38, 0.0 }
 0x236   : > { %v599_v58 = vadd.f32 %v598_v57, %v597_v56 }
 0x237   : > { %v624_v59 = vadd.f32 %v623_v55, %v622_v54  ;;  %v596_v60 = vld [vmem:[#allocation2 + $0x18] sm:$0xff] }
 0x238   : > { %v601_v62 = vadd.f32 %v600_v61, %v599_v58  ;;  %v602_v63 = vsel %vm224_vm0, %v596_v60, 0.0  ;;  %vm637_vm0 = vcmask 0  }
 0x239   : > { %625 = vadd.xlane.f32.xlu0 %v624_v59 }
 0x23a   : > { %v603_v1 = vadd.f32 %v602_v63, %v601_v62 }
 0x23c   : > { %604 = vadd.xlane.f32.xlu1 %v603_v1 }
 0x2c2   : > { %v626_v2 = vpop.xlane.xlu0 %625 }
 0x2c3   : > { %v627_v3 = vrot.slane %v626_v2, 4 }
 0x2c5   : > { %v628_v4 = vadd.f32 %v627_v3, %v626_v2  ;;  %v605_v5 = vpop.xlane.xlu1 %604 }
 0x2c6   : > { %v606_v20 = vrot.slane %v605_v5, 4 }
 0x2c7   : > { %v629_v6 = vrot.slane %v628_v4, 2 }
 0x2c8   : > { %v607_v7 = vadd.f32 %v606_v20, %v605_v5 }
 0x2c9   : > { %v630_v8 = vadd.f32 %v629_v6, %v628_v4 }
 0x2ca   : > { %v608_v9 = vrot.slane %v607_v7, 2 }
 0x2cb   : > { %v631_v15 = vrot.slane %v630_v8, 1 }
 0x2cc   : > { %v609_v10 = vadd.f32 %v608_v9, %v607_v7 }
 0x2cd   : > { %v632_v13 = vadd.f32 %v631_v15, %v630_v8 }
 0x2ce   : > { %v610_v11 = vrot.slane %v609_v10, 1 }
 0x2d0   : > { %v611_v12 = vadd.f32 %v610_v11, %v609_v10 }
 0x2d2   : > { %775 = vpush %v611_v12 }
 0x2d3   : > { %777 = vpush %v632_v13 }
 0x303   : > { %s776_s8 = spop %775 }
 0x304   : > { %s613_s9 = smul.f32 0.033333335, %s776_s8  ;;  %s778_s10 = spop %777 }
 0x305   : > { %s634_s11 = smul.f32 0.00026041668, %s778_s10 }
 0x307   : > { %s635_s12 = sadd.f32 %s634_s11, %s613_s9 }
 0x309   : > { %v636_v22 = vstv %s635_s12 }
 0x30a   : > { %638 = vst.msk [vmem:[%s218_s23] sm:$0x1] %vm637_vm0, %v636_v22 }
 0x30b PF: > { %s13_s14 = sadd.s32 1, %s901_s14   ;;  %s1117_s12 = smov %s897_s13 }
 0x30c   : > { %p10_p12 = scmp.ge.s32.totalorder %s13_s14, 4   ;;  %s1118_s13 = smov %s1120_s15 }
 0x30e   :  { %12 = sbr.rel (!%p10_p12) target bundleno = 2 (0x2), region = 73 }
 0x313   :  { %656 = vsyncmov [#allocation5] }
 0x316   :  { %s657_s19 = vpop.sfrf %656 }
 0x317   :  { %p744_p13 = scmp.ne.s32.totalorder %s657_s19, 0 }
 0x319   :  { %661 = shalt.err (%p744_p13)  }

</bundles_post_ra>
